<compile_context>
chip_gen: v7x
topology: tpu7x:2x2x1
jax: 0.10.0
libtpu: 0.0.40
codegen_flags: <defaults>
</compile_context>

<pallas_src>
import functools

import jax
import jax.numpy as jnp
from jax.experimental import pallas as pl
from jax.experimental.pallas import tpu as pltpu


def _round_up(v, m):
    return ((v + m - 1) // m) * m


def _make_kernel(n_true, h_true, tn):
    """n_true: real row count, h_true: real latent width, tn: row-tile size."""

    def kernel(x_ref, w_enc_ref, b_enc_ref, cb_ref, c_sq_ref, w_dec_ref, b_dec_ref,
               xrec_ref, loss_ref, perp_ref,
               counts_ref, loss_vec_ref):
        i = pl.program_id(0)

        # ---- init cross-tile accumulators (P3 pattern) ----
        @pl.when(i == 0)
        def _init():
            counts_ref[...] = jnp.zeros_like(counts_ref)
            loss_vec_ref[...] = jnp.zeros_like(loss_vec_ref)

        # ---- encoder: linear + ReLU (bf16 MXU, f32 accumulate) ----
        x = x_ref[...]                                             # (TN, Dp) f32
        z = jnp.dot(x.astype(jnp.bfloat16), w_enc_ref[...],
                    preferred_element_type=jnp.float32)            # (TN, Hp)
        z = jnp.maximum(z + b_enc_ref[...], 0.0)                   # f32

        # ---- vector quantization: argmin_k ||z - c_k||^2 ----
        # z_sq is a per-row constant -> dropped (argmin-invariant).
        cb = cb_ref[...]                                           # (Kp, Hp) bf16
        cross = jnp.dot(z.astype(jnp.bfloat16), cb.T,
                        preferred_element_type=jnp.float32)        # (TN, Kp) f32
        scores = c_sq_ref[...] - 2.0 * cross                       # (TN, Kp) f32

        tn_, kp = scores.shape
        smin = jnp.min(scores, axis=-1, keepdims=True)             # (TN, 1)
        lane_iota = jax.lax.broadcasted_iota(jnp.int32, (tn_, kp), 1)
        # first index attaining the minimum (torch.argmin tie-breaking)
        masked_iota = jnp.where(scores == smin, lane_iota, kp)
        first_idx = jnp.min(masked_iota, axis=-1, keepdims=True)   # (TN, 1)
        onehot = (lane_iota == first_idx).astype(jnp.float32)      # (TN, Kp)

        # row-validity mask (rows padded up to a tile multiple contribute nothing)
        row = i * tn + jax.lax.broadcasted_iota(jnp.int32, (tn_, 1), 0)
        valid = (row < n_true).astype(jnp.float32)                 # (TN, 1)

        # quantized latent (bf16 selection matmul, f32 accumulate)
        z_q = jnp.dot(onehot.astype(jnp.bfloat16), cb,
                      preferred_element_type=jnp.float32)          # (TN, Hp)

        # ---- accumulate commitment-loss partials and codebook usage ----
        diff = (z_q - z) * valid                                   # padded cols are 0
        loss_vec_ref[...] += jnp.sum(diff * diff, axis=0, keepdims=True)   # (1, Hp)
        counts_ref[...] += jnp.sum(onehot * valid, axis=0, keepdims=True)  # (1, Kp)

        # ---- decoder: linear (bf16 MXU, f32 accumulate), lane-dense store ----
        x_rec = jnp.dot(z_q.astype(jnp.bfloat16), w_dec_ref[...],
                        preferred_element_type=jnp.float32) + b_dec_ref[...]
        xrec_ref[...] = x_rec.astype(xrec_ref.dtype)

        # ---- finalize scalars at the last grid step ----
        @pl.when(i == pl.num_programs(0) - 1)
        def _fin():
            loss = jnp.sum(loss_vec_ref[...]) / jnp.float32(n_true * h_true)
            avg = counts_ref[...] / jnp.float32(n_true)            # (1, Kp)
            perp = jnp.exp(-jnp.sum(avg * jnp.log(avg + 1e-10)))
            loss_ref[0, 0] = loss
            perp_ref[0, 0] = perp

    return kernel


def _vmem_limit_bytes(tn, dp, hp, kp):
    f32, bf16 = 4, 2
    tiles = 2 * 2 * tn * dp * f32                     # x + x_rec, double-buffered
    weights = bf16 * (dp * hp + kp * hp + hp * dp) + f32 * (hp + kp + dp)
    interm = f32 * tn * (2 * hp + 3 * kp)             # z, z_q, scores/iota/onehot
    scratch = f32 * (kp + hp)
    est = 2 * (tiles + weights + interm + scratch)    # 2x headroom
    return int(min(48 * 2 ** 20, max(32 * 2 ** 20, est)))


@functools.partial(jax.jit, static_argnames=("tile_rows",))
def vqvae_forward(x, params, *, tile_rows=512):
    """x: [B, T, D] float32.  Returns (x_recon [B,T,D], commit_loss, perplexity)."""
    B, T, D = x.shape
    N = B * T
    w_enc, b_enc, codebook, w_dec, b_dec = params
    H = w_enc.shape[1]
    K = codebook.shape[0]

    # lane-dense padded dims (multiples of 128), sublane-friendly row tile
    Dp = _round_up(D, 128)
    Hp = _round_up(H, 128)
    Kp = _round_up(K, 128)
    # tile_rows ~512 fits comfortably on v7x's 64 MiB VMEM; v5e/v6e can go larger.
    tn = _round_up(min(tile_rows, _round_up(N, 8)), 8)
    Np = _round_up(N, tn)
    grid = Np // tn

    # --- pad operands once in the wrapper (loop-invariant hoists) ---
    x_flat = x.reshape(N, D).astype(jnp.float32)
    x_pad = jnp.zeros((Np, Dp), jnp.float32).at[:N, :D].set(x_flat)

    w_enc_p = jnp.zeros((Dp, Hp), jnp.float32).at[:D, :H].set(w_enc).astype(jnp.bfloat16)
    b_enc_p = jnp.zeros((1, Hp), jnp.float32).at[:, :H].set(b_enc)
    cb_p = jnp.zeros((Kp, Hp), jnp.float32).at[:K, :H].set(codebook).astype(jnp.bfloat16)
    # codebook norms computed once; padded (fake) codes get a huge norm so they never win
    c_sq = jnp.sum(cb_p.astype(jnp.float32) ** 2, axis=-1)
    c_sq = jnp.where(jnp.arange(Kp) < K, c_sq, jnp.float32(1e30))[None, :]
    w_dec_p = jnp.zeros((Hp, Dp), jnp.float32).at[:H, :D].set(w_dec).astype(jnp.bfloat16)
    b_dec_p = jnp.zeros((1, Dp), jnp.float32).at[:, :D].set(b_dec)

    kernel = _make_kernel(N, H, tn)

    xrec_pad, loss, perp = pl.pallas_call(
        kernel,
        grid_spec=pltpu.PrefetchScalarGridSpec(
            num_scalar_prefetch=0,
            grid=(grid,),
            in_specs=[
                pl.BlockSpec((tn, Dp), lambda i: (i, 0)),      # x tile (streamed)
                pl.BlockSpec((Dp, Hp), lambda i: (0, 0)),      # w_enc (resident)
                pl.BlockSpec((1, Hp), lambda i: (0, 0)),       # b_enc
                pl.BlockSpec((Kp, Hp), lambda i: (0, 0)),      # codebook
                pl.BlockSpec((1, Kp), lambda i: (0, 0)),       # c_sq (precomputed)
                pl.BlockSpec((Hp, Dp), lambda i: (0, 0)),      # w_dec
                pl.BlockSpec((1, Dp), lambda i: (0, 0)),       # b_dec
            ],
            out_specs=(
                pl.BlockSpec((tn, Dp), lambda i: (i, 0)),      # x_rec tile (lane-dense)
                pl.BlockSpec(memory_space=pltpu.SMEM),         # loss scalar
                pl.BlockSpec(memory_space=pltpu.SMEM),         # perplexity scalar
            ),
            scratch_shapes=[
                pltpu.VMEM((1, Kp), jnp.float32),              # code-usage counts
                pltpu.VMEM((1, Hp), jnp.float32),              # loss partial sums
            ],
        ),
        out_shape=(
            jax.ShapeDtypeStruct((Np, Dp), jnp.float32),
            jax.ShapeDtypeStruct((1, 1), jnp.float32),
            jax.ShapeDtypeStruct((1, 1), jnp.float32),
        ),
        compiler_params=pltpu.CompilerParams(
            dimension_semantics=("arbitrary",),                # cross-tile accumulators
            vmem_limit_bytes=_vmem_limit_bytes(tn, Dp, Hp, Kp),
        ),
    )(x_pad, w_enc_p, b_enc_p, cb_p, c_sq, w_dec_p, b_dec_p)

    x_rec = xrec_pad[:N, :D].reshape(B, T, D)
    return x_rec, loss[0, 0], perp[0, 0]


def _reference(x, params):
    """Pure-JAX reference mirroring the kernel numerics (bf16 matmul operands,
    f32 accumulation, z_sq-free argmin)."""
    w_enc, b_enc, codebook, w_dec, b_dec = params
    B, T, D = x.shape
    K = codebook.shape[0]
    bf = jnp.bfloat16
    xf = x.reshape(B * T, D)
    z = jnp.maximum(
        jnp.dot(xf.astype(bf), w_enc.astype(bf), preferred_element_type=jnp.float32)
        + b_enc, 0.0)
    cb16 = codebook.astype(bf)
    c_sq = jnp.sum(cb16.astype(jnp.float32) ** 2, axis=-1)[None, :]
    cross = jnp.dot(z.astype(bf), cb16.T, preferred_element_type=jnp.float32)
    scores = c_sq - 2.0 * cross            # same argmin as the full L2 distance
    idx = jnp.argmin(scores, axis=-1)
    onehot = jax.nn.one_hot(idx, K, dtype=jnp.float32)
    z_q = jnp.dot(onehot.astype(bf), cb16, preferred_element_type=jnp.float32)
    loss = jnp.mean((z_q - z) ** 2)
    avg = jnp.mean(onehot, axis=0)
    perp = jnp.exp(-jnp.sum(avg * jnp.log(avg + 1e-10)))
    x_rec = (jnp.dot(z_q.astype(bf), w_dec.astype(bf),
                     preferred_element_type=jnp.float32) + b_dec).reshape(B, T, D)
    return x_rec, loss, perp


if __name__ == "__main__":
    # Small shapes: B=2, T=16 frames, D=32 motion features, H=64 latent, K=128 codes.
    B, T, D, H, K = 2, 16, 32, 64, 128

    key = jax.random.PRNGKey(0)
    kx, k1, k2, k3, k4, k5 = jax.random.split(key, 6)

    x = jax.random.normal(kx, (B, T, D), dtype=jnp.float32)

    # Deterministic synthetic VQ-VAE parameters (no checkpoint load).
    w_enc = jax.random.normal(k1, (D, H), dtype=jnp.float32) * 0.1
    b_enc = jax.random.normal(k2, (1, H), dtype=jnp.float32) * 0.01
    codebook = jax.random.normal(k3, (K, H), dtype=jnp.float32) * 0.1
    w_dec = jax.random.normal(k4, (H, D), dtype=jnp.float32) * 0.1
    b_dec = jax.random.normal(k5, (1, D), dtype=jnp.float32) * 0.01
    params = (w_enc, b_enc, codebook, w_dec, b_dec)

    x_rec, loss, perp = vqvae_forward(x, params)
    jax.block_until_ready((x_rec, loss, perp))

    # Sanity-check against the pure-JAX reference.
    xr_r, loss_r, perp_r = _reference(x, params)
    assert jnp.allclose(x_rec, xr_r, atol=2e-3, rtol=2e-3), "x_recon mismatch"
    assert jnp.allclose(loss, loss_r, atol=1e-4, rtol=1e-3), "loss mismatch"
    assert jnp.allclose(perp, perp_r, atol=1e-2, rtol=1e-3), "perplexity mismatch"

    print("KERNEL_OK")
</pallas_src>

<mosaic_0001>
module attributes {stable_mosaic.version = 11 : i64} {
  func.func @kernel(%arg0: i32, %arg1: memref<32x128xf32, #tpu.memory_space<vmem>>, %arg2: memref<128x128xbf16, #tpu.memory_space<vmem>>, %arg3: memref<1x128xf32, #tpu.memory_space<vmem>>, %arg4: memref<128x128xbf16, #tpu.memory_space<vmem>>, %arg5: memref<1x128xf32, #tpu.memory_space<vmem>>, %arg6: memref<128x128xbf16, #tpu.memory_space<vmem>>, %arg7: memref<1x128xf32, #tpu.memory_space<vmem>>, %arg8: memref<32x128xf32, #tpu.memory_space<vmem>>, %arg9: memref<1x1xf32, #tpu.memory_space<smem>>, %arg10: memref<1x1xf32, #tpu.memory_space<smem>>, %arg11: memref<1x128xf32, #tpu.memory_space<vmem>>, %arg12: memref<1x128xf32, #tpu.memory_space<vmem>>) attributes {dimension_semantics = [#tpu.dimension_semantics<arbitrary>], iteration_bounds = array<i64: 1>, scalar_prefetch = 0 : i64, scratch_operands = 2 : i64, tpu.core_type = #tpu.core_type<tc>, window_params = [{transform_indices = @transform_0, window_bounds = array<i64: 32, 128>}, {pipeline_mode = #tpu.pipeline_mode<synchronous>, transform_indices = @transform_1, window_bounds = array<i64: 128, 128>}, {pipeline_mode = #tpu.pipeline_mode<synchronous>, transform_indices = @transform_2, window_bounds = array<i64: 1, 128>}, {pipeline_mode = #tpu.pipeline_mode<synchronous>, transform_indices = @transform_3, window_bounds = array<i64: 128, 128>}, {pipeline_mode = #tpu.pipeline_mode<synchronous>, transform_indices = @transform_4, window_bounds = array<i64: 1, 128>}, {pipeline_mode = #tpu.pipeline_mode<synchronous>, transform_indices = @transform_5, window_bounds = array<i64: 128, 128>}, {pipeline_mode = #tpu.pipeline_mode<synchronous>, transform_indices = @transform_6, window_bounds = array<i64: 1, 128>}, {transform_indices = @transform_7, window_bounds = array<i64: 32, 128>}, {transform_indices = @transform_8, window_bounds = array<i64: 1, 1>}, {transform_indices = @transform_9, window_bounds = array<i64: 1, 1>}]} {
    %c0_i32 = arith.constant 0 : i32
    %0 = arith.cmpi eq, %arg0, %c0_i32 : i32
    %1 = arith.extui %0 : i1 to i32
    %c0_i32_0 = arith.constant 0 : i32
    %2 = arith.cmpi ne, %1, %c0_i32_0 : i32
    scf.if %2 {
      %cst_36 = arith.constant 0.000000e+00 : f32
      %70 = vector.broadcast %cst_36 : f32 to vector<1x128xf32>
      %c0_37 = arith.constant 0 : index
      %c0_38 = arith.constant 0 : index
      %71 = vector.load %arg11[%c0_37, %c0_38] : memref<1x128xf32, #tpu.memory_space<vmem>>, vector<1x128xf32>
      tpu.vector_store %arg11[%c0_37, %c0_38], %70 {strides = array<i32>} : memref<1x128xf32, #tpu.memory_space<vmem>>, vector<1x128xf32>,
      %cst_39 = arith.constant 0.000000e+00 : f32
      %72 = vector.broadcast %cst_39 : f32 to vector<1x128xf32>
      %c0_40 = arith.constant 0 : index
      %c0_41 = arith.constant 0 : index
      %73 = vector.load %arg12[%c0_40, %c0_41] : memref<1x128xf32, #tpu.memory_space<vmem>>, vector<1x128xf32>
      tpu.vector_store %arg12[%c0_40, %c0_41], %72 {strides = array<i32>} : memref<1x128xf32, #tpu.memory_space<vmem>>, vector<1x128xf32>,
    } else {
    }
    %c0 = arith.constant 0 : index
    %c0_1 = arith.constant 0 : index
    %3 = vector.load %arg1[%c0, %c0_1] : memref<32x128xf32, #tpu.memory_space<vmem>>, vector<32x128xf32>
    %4 = arith.truncf %3 : vector<32x128xf32> to vector<32x128xbf16>
    %c0_2 = arith.constant 0 : index
    %c0_3 = arith.constant 0 : index
    %5 = vector.load %arg2[%c0_2, %c0_3] : memref<128x128xbf16, #tpu.memory_space<vmem>>, vector<128x128xbf16>
    %cst = arith.constant dense<0.000000e+00> : vector<32x128xf32>
    %6 = tpu.matmul %4, %5, %cst {dimension_numbers = #tpu.dot_dimension_numbers<[1], [0], [0], [1], [0, 0, 1, 1], [], []>} : vector<32x128xbf16>, vector<128x128xbf16>, vector<32x128xf32> -> vector<32x128xf32>
    %c0_4 = arith.constant 0 : index
    %c0_5 = arith.constant 0 : index
    %7 = vector.load %arg3[%c0_4, %c0_5] : memref<1x128xf32, #tpu.memory_space<vmem>>, vector<1x128xf32>
    %8 = vector.broadcast %7 : vector<1x128xf32> to vector<32x128xf32>
    %9 = arith.addf %6, %8 : vector<32x128xf32>
    %cst_6 = arith.constant 0.000000e+00 : f32
    %10 = vector.broadcast %cst_6 : f32 to vector<32x128xf32>
    %11 = arith.maximumf %9, %10 : vector<32x128xf32>
    %c0_7 = arith.constant 0 : index
    %c0_8 = arith.constant 0 : index
    %12 = vector.load %arg4[%c0_7, %c0_8] : memref<128x128xbf16, #tpu.memory_space<vmem>>, vector<128x128xbf16>
    %13 = arith.truncf %11 : vector<32x128xf32> to vector<32x128xbf16>
    %14 = tpu.transpose %12, [1, 0] : vector<128x128xbf16> -> vector<128x128xbf16>
    %cst_9 = arith.constant dense<0.000000e+00> : vector<32x128xf32>
    %15 = tpu.matmul %13, %14, %cst_9 {dimension_numbers = #tpu.dot_dimension_numbers<[1], [0], [0], [1], [0, 0, 1, 1], [], []>} : vector<32x128xbf16>, vector<128x128xbf16>, vector<32x128xf32> -> vector<32x128xf32>
    %c0_10 = arith.constant 0 : index
    %c0_11 = arith.constant 0 : index
    %16 = vector.load %arg5[%c0_10, %c0_11] : memref<1x128xf32, #tpu.memory_space<vmem>>, vector<1x128xf32>
    %cst_12 = arith.constant 2.000000e+00 : f32
    %17 = vector.broadcast %cst_12 : f32 to vector<32x128xf32>
    %18 = arith.mulf %17, %15 : vector<32x128xf32>
    %19 = vector.broadcast %16 : vector<1x128xf32> to vector<32x128xf32>
    %20 = arith.subf %19, %18 : vector<32x128xf32>
    %cst_13 = arith.constant dense<0x7F800000> : vector<32xf32>
    %21 = vector.multi_reduction <minimumf>, %20, %cst_13 [1] : vector<32x128xf32> to vector<32xf32>
    %22 = vector.shape_cast %21 : vector<32xf32> to vector<32x1xf32>
    %23 = tpu.iota {dimensions = array<i32: 1>} : vector<32x128xi32>
    %24 = vector.broadcast %22 : vector<32x1xf32> to vector<32x128xf32>
    %25 = arith.cmpf oeq, %20, %24 : vector<32x128xf32>
    %c128_i32 = arith.constant 128 : i32
    %26 = vector.broadcast %c128_i32 : i32 to vector<32x128xi32>
    %27 = arith.select %25, %23, %26 : vector<32x128xi1>, vector<32x128xi32>
    %cst_14 = arith.constant dense<2147483647> : vector<32xi32>
    %28 = vector.multi_reduction <minsi>, %27, %cst_14 [1] : vector<32x128xi32> to vector<32xi32>
    %29 = vector.shape_cast %28 : vector<32xi32> to vector<32x1xi32>
    %30 = vector.broadcast %29 : vector<32x1xi32> to vector<32x128xi32>
    %31 = arith.cmpi eq, %23, %30 : vector<32x128xi32>
    %32 = arith.extui %31 : vector<32x128xi1> to vector<32x128xi32>
    %33 = arith.sitofp %32 : vector<32x128xi32> to vector<32x128xf32>
    %c32_i32 = arith.constant 32 : i32
    %34 = arith.muli %arg0, %c32_i32 : i32
    %35 = tpu.iota {dimensions = array<i32: 0>} : vector<32x1xi32>
    %36 = vector.broadcast %34 : i32 to vector<32x1xi32>
    %37 = arith.addi %36, %35 : vector<32x1xi32>
    %c32_i32_15 = arith.constant 32 : i32
    %38 = vector.broadcast %c32_i32_15 : i32 to vector<32x1xi32>
    %39 = arith.cmpi slt, %37, %38 : vector<32x1xi32>
    %40 = arith.extui %39 : vector<32x1xi1> to vector<32x1xi32>
    %41 = arith.sitofp %40 : vector<32x1xi32> to vector<32x1xf32>
    %42 = arith.truncf %33 : vector<32x128xf32> to vector<32x128xbf16>
    %cst_16 = arith.constant dense<0.000000e+00> : vector<32x128xf32>
    %43 = tpu.matmul %42, %12, %cst_16 {dimension_numbers = #tpu.dot_dimension_numbers<[1], [0], [0], [1], [0, 0, 1, 1], [], []>} : vector<32x128xbf16>, vector<128x128xbf16>, vector<32x128xf32> -> vector<32x128xf32>
    %44 = arith.subf %43, %11 : vector<32x128xf32>
    %45 = vector.broadcast %41 : vector<32x1xf32> to vector<32x128xf32>
    %46 = arith.mulf %44, %45 : vector<32x128xf32>
    %c0_17 = arith.constant 0 : index
    %c0_18 = arith.constant 0 : index
    %47 = vector.load %arg12[%c0_17, %c0_18] : memref<1x128xf32, #tpu.memory_space<vmem>>, vector<1x128xf32>
    %48 = arith.mulf %46, %46 : vector<32x128xf32>
    %cst_19 = arith.constant dense<0.000000e+00> : vector<128xf32>
    %49 = vector.multi_reduction <add>, %48, %cst_19 [0] : vector<32x128xf32> to vector<128xf32>
    %50 = vector.shape_cast %49 : vector<128xf32> to vector<1x128xf32>
    %51 = arith.addf %47, %50 : vector<1x128xf32>
    %c0_20 = arith.constant 0 : index
    %c0_21 = arith.constant 0 : index
    %52 = vector.load %arg12[%c0_20, %c0_21] : memref<1x128xf32, #tpu.memory_space<vmem>>, vector<1x128xf32>
    tpu.vector_store %arg12[%c0_20, %c0_21], %51 {strides = array<i32>} : memref<1x128xf32, #tpu.memory_space<vmem>>, vector<1x128xf32>,
    %c0_22 = arith.constant 0 : index
    %c0_23 = arith.constant 0 : index
    %53 = vector.load %arg11[%c0_22, %c0_23] : memref<1x128xf32, #tpu.memory_space<vmem>>, vector<1x128xf32>
    %54 = vector.broadcast %41 : vector<32x1xf32> to vector<32x128xf32>
    %55 = arith.mulf %33, %54 : vector<32x128xf32>
    %cst_24 = arith.constant dense<0.000000e+00> : vector<128xf32>
    %56 = vector.multi_reduction <add>, %55, %cst_24 [0] : vector<32x128xf32> to vector<128xf32>
    %57 = vector.shape_cast %56 : vector<128xf32> to vector<1x128xf32>
    %58 = arith.addf %53, %57 : vector<1x128xf32>
    %c0_25 = arith.constant 0 : index
    %c0_26 = arith.constant 0 : index
    %59 = vector.load %arg11[%c0_25, %c0_26] : memref<1x128xf32, #tpu.memory_space<vmem>>, vector<1x128xf32>
    tpu.vector_store %arg11[%c0_25, %c0_26], %58 {strides = array<i32>} : memref<1x128xf32, #tpu.memory_space<vmem>>, vector<1x128xf32>,
    %60 = arith.truncf %43 : vector<32x128xf32> to vector<32x128xbf16>
    %c0_27 = arith.constant 0 : index
    %c0_28 = arith.constant 0 : index
    %61 = vector.load %arg6[%c0_27, %c0_28] : memref<128x128xbf16, #tpu.memory_space<vmem>>, vector<128x128xbf16>
    %cst_29 = arith.constant dense<0.000000e+00> : vector<32x128xf32>
    %62 = tpu.matmul %60, %61, %cst_29 {dimension_numbers = #tpu.dot_dimension_numbers<[1], [0], [0], [1], [0, 0, 1, 1], [], []>} : vector<32x128xbf16>, vector<128x128xbf16>, vector<32x128xf32> -> vector<32x128xf32>
    %c0_30 = arith.constant 0 : index
    %c0_31 = arith.constant 0 : index
    %63 = vector.load %arg7[%c0_30, %c0_31] : memref<1x128xf32, #tpu.memory_space<vmem>>, vector<1x128xf32>
    %64 = vector.broadcast %63 : vector<1x128xf32> to vector<32x128xf32>
    %65 = arith.addf %62, %64 : vector<32x128xf32>
    %c0_32 = arith.constant 0 : index
    %c0_33 = arith.constant 0 : index
    %66 = vector.load %arg8[%c0_32, %c0_33] : memref<32x128xf32, #tpu.memory_space<vmem>>, vector<32x128xf32>
    tpu.vector_store %arg8[%c0_32, %c0_33], %65 {strides = array<i32>} : memref<32x128xf32, #tpu.memory_space<vmem>>, vector<32x128xf32>,
    %c0_i32_34 = arith.constant 0 : i32
    %67 = arith.cmpi eq, %arg0, %c0_i32_34 : i32
    %68 = arith.extui %67 : i1 to i32
    %c0_i32_35 = arith.constant 0 : i32
    %69 = arith.cmpi ne, %68, %c0_i32_35 : i32
    scf.if %69 {
      %c0_36 = arith.constant 0 : index
      %c0_37 = arith.constant 0 : index
      %70 = vector.load %arg12[%c0_36, %c0_37] : memref<1x128xf32, #tpu.memory_space<vmem>>, vector<1x128xf32>
      %71 = vector.shape_cast %70 : vector<1x128xf32> to vector<1x1x128xf32>
      %cst_38 = arith.constant dense<0.000000e+00> : vector<1xf32>
      %72 = vector.multi_reduction <add>, %71, %cst_38 [1, 2] : vector<1x1x128xf32> to vector<1xf32>
      %73 = vector.shape_cast %72 : vector<1xf32> to vector<1x1x1xf32>
      %74 = vector.extract %73[0, 0, 0] : f32 from vector<1x1x1xf32>
      %cst_39 = arith.constant 2.048000e+03 : f32
      %75 = arith.divf %74, %cst_39 : f32
      %c0_40 = arith.constant 0 : index
      %c0_41 = arith.constant 0 : index
      %76 = vector.load %arg11[%c0_40, %c0_41] : memref<1x128xf32, #tpu.memory_space<vmem>>, vector<1x128xf32>
      %cst_42 = arith.constant 3.200000e+01 : f32
      %77 = vector.broadcast %cst_42 : f32 to vector<1x128xf32>
      %78 = arith.divf %76, %77 : vector<1x128xf32>
      %cst_43 = arith.constant 1.000000e-10 : f32
      %79 = vector.broadcast %cst_43 : f32 to vector<1x128xf32>
      %80 = arith.addf %78, %79 : vector<1x128xf32>
      %81 = math.log %80 : vector<1x128xf32>
      %82 = arith.mulf %78, %81 : vector<1x128xf32>
      %83 = vector.shape_cast %82 : vector<1x128xf32> to vector<1x1x128xf32>
      %cst_44 = arith.constant dense<0.000000e+00> : vector<1xf32>
      %84 = vector.multi_reduction <add>, %83, %cst_44 [1, 2] : vector<1x1x128xf32> to vector<1xf32>
      %85 = vector.shape_cast %84 : vector<1xf32> to vector<1x1x1xf32>
      %86 = vector.extract %85[0, 0, 0] : f32 from vector<1x1x1xf32>
      %cst_45 = arith.constant 0.000000e+00 : f32
      %87 = arith.subf %cst_45, %86 : f32
      %88 = math.exp %87 : f32
      %c0_46 = arith.constant 0 : index
      %c0_47 = arith.constant 0 : index
      %89 = memref.load %arg9[%c0_46, %c0_47] : memref<1x1xf32, #tpu.memory_space<smem>>
      memref.store %75, %arg9[%c0_46, %c0_47] : memref<1x1xf32, #tpu.memory_space<smem>>
      %c0_48 = arith.constant 0 : index
      %c0_49 = arith.constant 0 : index
      %90 = memref.load %arg10[%c0_48, %c0_49] : memref<1x1xf32, #tpu.memory_space<smem>>
      memref.store %88, %arg10[%c0_48, %c0_49] : memref<1x1xf32, #tpu.memory_space<smem>>
    } else {
    }
    return
  }
  func.func @transform_0(%arg0: i32) -> (i32, i32) {
    %c0_i32 = arith.constant 0 : i32
    %c0_i32_0 = arith.constant 0 : i32
    return %arg0, %c0_i32 : i32, i32
  }
  func.func @transform_1(%arg0: i32) -> (i32, i32) {
    %c0_i32 = arith.constant 0 : i32
    %c0_i32_0 = arith.constant 0 : i32
    %c0_i32_1 = arith.constant 0 : i32
    return %c0_i32, %c0_i32_0 : i32, i32
  }
  func.func @transform_2(%arg0: i32) -> (i32, i32) {
    %c0_i32 = arith.constant 0 : i32
    %c0_i32_0 = arith.constant 0 : i32
    %c0_i32_1 = arith.constant 0 : i32
    return %c0_i32, %c0_i32_0 : i32, i32
  }
  func.func @transform_3(%arg0: i32) -> (i32, i32) {
    %c0_i32 = arith.constant 0 : i32
    %c0_i32_0 = arith.constant 0 : i32
    %c0_i32_1 = arith.constant 0 : i32
    return %c0_i32, %c0_i32_0 : i32, i32
  }
  func.func @transform_4(%arg0: i32) -> (i32, i32) {
    %c0_i32 = arith.constant 0 : i32
    %c0_i32_0 = arith.constant 0 : i32
    %c0_i32_1 = arith.constant 0 : i32
    return %c0_i32, %c0_i32_0 : i32, i32
  }
  func.func @transform_5(%arg0: i32) -> (i32, i32) {
    %c0_i32 = arith.constant 0 : i32
    %c0_i32_0 = arith.constant 0 : i32
    %c0_i32_1 = arith.constant 0 : i32
    return %c0_i32, %c0_i32_0 : i32, i32
  }
  func.func @transform_6(%arg0: i32) -> (i32, i32) {
    %c0_i32 = arith.constant 0 : i32
    %c0_i32_0 = arith.constant 0 : i32
    %c0_i32_1 = arith.constant 0 : i32
    return %c0_i32, %c0_i32_0 : i32, i32
  }
  func.func @transform_7(%arg0: i32) -> (i32, i32) {
    %c0_i32 = arith.constant 0 : i32
    %c0_i32_0 = arith.constant 0 : i32
    return %arg0, %c0_i32 : i32, i32
  }
  func.func @transform_8(%arg0: i32) -> (i32, i32) {
    %c0_i32 = arith.constant 0 : i32
    %c0_i32_0 = arith.constant 0 : i32
    %c0_i32_1 = arith.constant 0 : i32
    return %c0_i32, %c0_i32_0 : i32, i32
  }
  func.func @transform_9(%arg0: i32) -> (i32, i32) {
    %c0_i32 = arith.constant 0 : i32
    %c0_i32_0 = arith.constant 0 : i32
    %c0_i32_1 = arith.constant 0 : i32
    return %c0_i32, %c0_i32_0 : i32, i32
  }
}

</mosaic_0001>

<bundles_post_ra>
// kernel: vqvae_forward.1
= control target key start
LH: loop header
LB: loop body
LE: loop exit
PB: predicated region body
PF: predicated region fallthrough
CT: control target
= control target key end

     0   :  { %15 = vsyncpa [#allocation5], 0  ;;  %s1180_s0 = inlined_call_operand.vmem [shape: f32[32,128], index: 0, kind: input, shape index: {}]   ;;  %s1181_s1 = inlined_call_operand.vmem [shape: bf16[128,128], index: 1, kind: input, shape index: {}]   ;;  %s1182_s2 = inlined_call_operand.vmem [shape: f32[1,128], index: 2, kind: input, shape index: {}]   ;;  %s1183_s3 = inlined_call_operand.vmem [shape: bf16[128,128], index: 3, kind: input, shape index: {}]   ;;  %s1184_s4 = inlined_call_operand.vmem [shape: f32[1,128], index: 4, kind: input, shape index: {}]   ;;  %s1185_s5 = inlined_call_operand.vmem [shape: bf16[128,128], index: 5, kind: input, shape index: {}]   ;;  %s1186_s6 = inlined_call_operand.vmem [shape: f32[1,128], index: 6, kind: input, shape index: {}]   ;;  %s1187_s7 = inlined_call_operand.hbm [shape: f32[32,128], index: 7, kind: output, shape index: {0}]   ;;  %s1188_s8 = inlined_call_operand.hbm [shape: f32[1,1], index: 8, kind: output, shape index: {1}]   ;;  %s1189_s9 = inlined_call_operand.hbm [shape: f32[1,1], index: 9, kind: output, shape index: {2}]  }
   0x1   :  { %16 = vsyncpa [#allocation6], 0  ;;  %v878_v0 = vld [vmem:[%s1181_s1] sm:$0xff]   ;;  %v879_v1 = vld [vmem:[%s1181_s1 + $0x8] sm:$0xff]  }
   0x2   :  { %785 = vmatprep.subr.bf16.mxu0 %v878_v0  ;;  %v880_v2 = vld [vmem:[%s1181_s1 + $0x10] sm:$0xff]   ;;  %v881_v3 = vld [vmem:[%s1181_s1 + $0x18] sm:$0xff]   ;;  %v39_v4 = vld [vmem:[%s1180_s0] sm:$0xff] }
   0x3   :  { %786 = vmatpush3.bf16.msra.mxu0 %v878_v0  ;;  %v40_v5 = vld [vmem:[%s1180_s0 + $0x8] sm:$0xff]  ;;  %v886_v7 = vld [vmem:[%s1183_s3] sm:$0xff]   ;;  %v888_v11 = vld [vmem:[%s1183_s3 + $0x10] sm:$0xff]  }
   0x4   :  { %787 = vmatprep.subr.bf16.mxu0 %v879_v1  ;;  %v43_v6 = vpack.c.bf16 %v40_v5, %v39_v4  ;;  %v887_v8 = vld [vmem:[%s1183_s3 + $0x8] sm:$0xff]   ;;  %v882_v9 = vld [vmem:[%s1181_s1 + $0x20] sm:$0xff]   ;;  %805 = vmatprep.subr.bf16.mxu1 %v886_v7  ;;  %v884_v12 = vld [vmem:[%s1181_s1 + $0x30] sm:$0xff]  }
   0x5   :  { %806 = vmatpush3.bf16.xpose.msra.mxu1 %v886_v7  ;;  %v883_v10 = vld [vmem:[%s1181_s1 + $0x28] sm:$0xff]  }
   0x6   :  { %801 = vmatprep.mubr.bf16.mxu0 %v43_v6  ;;  %807 = vmatprep.subr.bf16.mxu1 %v887_v8 }
   0x7   :  { %788 = vmatpush3.bf16.msra.mxu0 %v879_v1 }
   0x8   :  { %789 = vmatprep.subr.bf16.mxu0 %v880_v2 }
   0xb   :  { %790 = vmatpush3.bf16.msra.mxu0 %v880_v2 }
   0xc   :  { %791 = vmatprep.subr.bf16.mxu0 %v881_v3 }
   0xd   :  { %808 = vmatpush3.bf16.xpose.msra.mxu1 %v887_v8 }
   0xe   :  { %809 = vmatprep.subr.bf16.mxu1 %v888_v11 }
   0xf   :  { %792 = vmatpush3.bf16.msra.mxu0 %v881_v3 }
  0x10   :  { %793 = vmatprep.subr.bf16.mxu0 %v882_v9 }
  0x13   :  { %794 = vmatpush3.bf16.msra.mxu0 %v882_v9 }
  0x14   :  { %795 = vmatprep.subr.bf16.mxu0 %v883_v10 }
  0x15   :  { %17 = vsyncpa [#allocation9], 0  ;;  %v885_v13 = vld [vmem:[%s1181_s1 + $0x38] sm:$0xff]   ;;  %v41_v15 = vld [vmem:[%s1180_s0 + $0x10] sm:$0xff]  ;;  %810 = vmatpush3.bf16.xpose.msra.mxu1 %v888_v11  ;;  %v307_v50 = vlaneseq  ;;  %vm629_vm14 = vcmask 1040384   ;;  %s956_s22 = smov [#allocation4]  }
  0x16   :  { %v889_v14 = vld [vmem:[%s1183_s3 + $0x18] sm:$0xff]   ;;  %v890_v18 = vld [vmem:[%s1183_s3 + $0x20] sm:$0xff]   ;;  %v891_v19 = vld [vmem:[%s1183_s3 + $0x28] sm:$0xff]  }
  0x17   :  { %796 = vmatpush3.bf16.msra.mxu0 %v883_v10  ;;  %v42_v16 = vld [vmem:[%s1180_s0 + $0x18] sm:$0xff]  ;;  %811 = vmatprep.subr.bf16.mxu1 %v889_v14  ;;  %v892_v20 = vld [vmem:[%s1183_s3 + $0x30] sm:$0xff]   ;;  %v710_v22 = vld [vmem:[%s1182_s2] ss:$0 sm:$0xff]  ;;  %v1097_v51 = vand.u32 127, %v307_v50  ;;  %s674_s0 = sshll.u32 %s956_s22, 4  ;;  %s675_s0 = int_to_ptr.vmem [resolvable:$true] %s674_s0 }
  0x18   :  { %797 = vmatprep.subr.bf16.mxu0 %v884_v12  ;;  %v44_v17 = vpack.c.bf16 %v42_v16, %v41_v15  ;;  %v893_v21 = vld [vmem:[%s1183_s3 + $0x38] sm:$0xff]   ;;  %v727_v38 = vld [vmem:[%s1184_s4] ss:$0 sm:$0xff]  ;;  %s906_s23 = scalar_lea.vmem %s675_s0, 512  ;;  %p911_p1 = scmp.lt.s32.totalorder %s675_s0, %s675_s0 }
  0x19   :  { %p907_p0 = scmp.ne.s32.totalorder %s675_s0, %s906_s23  ;;  %p912_p2 = scmp.lt.s32.totalorder %s906_s23, %s906_s23 }
  0x1b   :  { %798 = vmatpush3.bf16.msra.mxu0 %v884_v12  ;;  %p913_p3 = por %p912_p2, %p911_p1 }
  0x1c   :  { %799 = vmatprep.subr.bf16.mxu0 %v885_v13 }
  0x1d   :  { %812 = vmatpush3.bf16.xpose.msra.mxu1 %v889_v14  ;;  %p914_p4 = pnand %p913_p3, %p907_p0 }
  0x1e   :  { %813 = vmatprep.subr.bf16.mxu1 %v890_v18 }
  0x1f   :  { %800 = vmatpush3.bf16.msra.mxu0 %v885_v13 }
  0x20   :  { %825 = vmatprep.subr.bf16.mxu0 %v886_v7 }
  0x22   :  { %802 = vmatmul.mubr.bf16.vlgmr.msra.gmra.mrb[0].mxu0 %v44_v17 }
  0x23   :  { %826 = vmatpush3.bf16.msra.mxu0 %v886_v7 }
  0x24   :  { %827 = vmatprep.subr.bf16.mxu0 %v887_v8 }
  0x25   :  { %814 = vmatpush3.bf16.xpose.msra.mxu1 %v890_v18 }
  0x26   :  { %815 = vmatprep.subr.bf16.mxu1 %v891_v19 }
  0x27   :  { %828 = vmatpush3.bf16.msra.mxu0 %v887_v8 }
  0x28   :  { %829 = vmatprep.subr.bf16.mxu0 %v888_v11 }
  0x2b   :  { %830 = vmatpush3.bf16.msra.mxu0 %v888_v11 }
  0x2c   :  { %831 = vmatprep.subr.bf16.mxu0 %v889_v14 }
  0x2d   :  { %816 = vmatpush3.bf16.xpose.msra.mxu1 %v891_v19 }
  0x2e   :  { %817 = vmatprep.subr.bf16.mxu1 %v892_v20 }
  0x2f   :  { %832 = vmatpush3.bf16.msra.mxu0 %v889_v14 }
  0x30   :  { %833 = vmatprep.subr.bf16.mxu0 %v890_v18 }
  0x33   :  { %834 = vmatpush3.bf16.msra.mxu0 %v890_v18 }
  0x34   :  { %835 = vmatprep.subr.bf16.mxu0 %v891_v19 }
  0x35   :  { %818 = vmatpush3.bf16.xpose.msra.mxu1 %v892_v20 }
  0x36   :  { %819 = vmatprep.subr.bf16.mxu1 %v893_v21 }
  0x37   :  { %836 = vmatpush3.bf16.msra.mxu0 %v891_v19 }
  0x38   :  { %837 = vmatprep.subr.bf16.mxu0 %v892_v20 }
  0x3b   :  { %838 = vmatpush3.bf16.msra.mxu0 %v892_v20  ;;  %v954_v20 = vmov 0.0  }
  0x3c   :  { %839 = vmatprep.subr.bf16.mxu0 %v893_v21  ;;  %37 = vst [vmem:[#allocation2] sm:$0x1] %v954_v20  ;;  %38 = vst [vmem:[#allocation3] sm:$0x1] %v954_v20 }
  0x3d   :  { %820 = vmatpush3.bf16.xpose.msra.mxu1 %v893_v21 }
  0x3f   :  { %840 = vmatpush3.bf16.msra.mxu0 %v893_v21 }
  0xf5   :  { %v803_v23 = vpop.f32.mrb[0].mxu0 }
  0xf6   :  { %v150_v24 = vpop.f32.mrb[1].mxu0  ;;  %v1076_v27 = vadd.f32 %v803_v23, %v710_v22 }
  0xf7   :  { %v1074_v25 = vadd.f32 %v710_v22, %v150_v24  ;;  %v804_v26 = vpop.f32.mrb[2].mxu0 }
  0xf8   :  { %v1078_v28 = vadd.f32 %v804_v26, %v710_v22  ;;  %v153_v29 = vpop.f32.mrb[3].mxu0  ;;  %v167_v34 = vmax.f32 %v1076_v27, 0.0 }
  0xf9   :  { %v1080_v30 = vadd.f32 %v710_v22, %v153_v29  ;;  %v165_v32 = vmax.f32 %v1074_v25, 0.0 }
  0xfa   :  { %v168_v31 = vmax.f32 %v1078_v28, 0.0 }
  0xfb   :  { %v166_v33 = vmax.f32 %v1080_v30, 0.0  ;;  %v467_v30 = vld [vmem:[#allocation3] sm:$0x1] }
  0xfc   :  { %v186_v36 = vpack.c.bf16 %v168_v31, %v167_v34 }
  0xfd   :  { %v185_v35 = vpack.c.bf16 %v166_v33, %v165_v32 }
  0xff   :  { %821 = vmatprep.mubr.bf16.mxu1 %v185_v35 }
 0x100   :  { %822 = vmatmul.mubr.bf16.vlgmr.msra.gmra.mrb[0].mxu1 %v186_v36 }
 0x1d3   :  { %v823_v37 = vpop.f32.mrb[0].mxu1 }
 0x1d4   :  { %v287_v39 = vmul.f32 2.0, %v823_v37  ;;  %v269_v40 = vpop.f32.mrb[1].mxu1 }
 0x1d5   :  { %v285_v41 = vmul.f32 2.0, %v269_v40  ;;  %v824_v42 = vpop.f32.mrb[2].mxu1 }
 0x1d6   :  { %v288_v43 = vmul.f32 2.0, %v824_v42  ;;  %v272_v44 = vpop.f32.mrb[3].mxu1  ;;  %v297_v45 = vsub.f32 %v727_v38, %v287_v39 }
 0x1d7   :  { %v286_v46 = vmul.f32 2.0, %v272_v44  ;;  %v295_v47 = vsub.f32 %v727_v38, %v285_v41 }
 0x1d8   :  { %303 = vmin.xlane.f32.xlu1 %v297_v45  ;;  %v298_v48 = vsub.f32 %v727_v38, %v288_v43 }
 0x1d9   :  { %299 = vmin.xlane.f32.xlu0 %v295_v47  ;;  %v296_v49 = vsub.f32 %v727_v38, %v286_v46 }
 0x1dc   :  { %305 = vmin.xlane.f32.xlu1 %v298_v48 }
 0x1dd   :  { %301 = vmin.xlane.f32.xlu0 %v296_v49 }
 0x265   :  { %v304_v52 = vpop.xlane.xlu1 %303 }
 0x266   :  { %vm311_vm0 = vcmp.eq.f32.partialorder %v297_v45, %v304_v52  ;;  %v300_v53 = vpop.xlane.xlu0 %299  ;;  %v955_v52 = vmov 1.0|1.0  }
 0x267   :  { %vm309_vm1 = vcmp.eq.f32.partialorder %v295_v47, %v300_v53  ;;  %v315_v54 = vsel %vm311_vm0, %v1097_v51, 128 }
 0x268   :  { %v313_v55 = vsel %vm309_vm1, %v1097_v51, 128  ;;  %v346_v60 = vshra.s32 %v315_v54, 16  ;;  %v345_v5 = vand.u32 65535, %v315_v54 }
 0x269   :  { %v306_v56 = vpop.xlane.xlu1 %305  ;;  %v318_v57 = vshra.s32 %v313_v55, 16  ;;  %v317_v4 = vand.u32 65535, %v313_v55 }
 0x26a   :  { %vm312_vm2 = vcmp.eq.f32.partialorder %v298_v48, %v306_v56  ;;  %v302_v58 = vpop.xlane.xlu0 %301  ;;  %v348_v0 = vcvt.s32.f32 %v346_v60  ;;  %v347_v14 = vcvt.s32.f32 %v345_v5 }
 0x26b   :  { %vm310_vm3 = vcmp.eq.f32.partialorder %v296_v49, %v302_v58  ;;  %v320_v59 = vcvt.s32.f32 %v318_v57  ;;  %v316_v61 = vsel %vm312_vm2, %v1097_v51, 128  ;;  %v319_v8 = vcvt.s32.f32 %v317_v4 }
 0x26c   :  { %v314_v62 = vsel %vm310_vm3, %v1097_v51, 128  ;;  %v360_v2 = vshra.s32 %v316_v61, 16  ;;  %v359_v10 = vand.u32 65535, %v316_v61 }
 0x26d   :  { %321 = vmin.xlane.f32.xlu0 %v320_v59  ;;  %v332_v63 = vshra.s32 %v314_v62, 16  ;;  %v331_v6 = vand.u32 65535, %v314_v62 }
 0x26e   :  { %v362_v3 = vcvt.s32.f32 %v360_v2  ;;  %v361_v18 = vcvt.s32.f32 %v359_v10  ;;  %v896_v10 = vld [vmem:[%s1185_s5 + $0x10] sm:$0xff]  }
 0x26f   :  { %v334_v1 = vcvt.s32.f32 %v332_v63  ;;  %v333_v13 = vcvt.s32.f32 %v331_v6  ;;  %v483_v63 = vld [vmem:[#allocation2] sm:$0x1] }
 0x271   :  { %349 = vmin.xlane.f32.xlu0 %v348_v0  ;;  %335 = vmin.xlane.f32.xlu1 %v334_v1 }
 0x275   :  { %363 = vmin.xlane.f32.xlu1 %v362_v3 }
 0x2fa   :  { %v322_v7 = vpop.xlane.xlu0 %321 }
 0x2fb   :  { %vm323_vm4 = vcmp.eq.f32.partialorder %v320_v59, %v322_v7  ;;  %v328_v21 = vcvt.f32.s32 %v322_v7 }
 0x2fc   :  { %v324_v9 = vsel %vm323_vm4, %v319_v8, inf  ;;  %v894_v8 = vld [vmem:[%s1185_s5] sm:$0xff]  }
 0x2fd   :  { %325 = vmin.xlane.f32.xlu0 %v324_v9  ;;  %v329_v24 = vshll.u32 %v328_v21, 16  ;;  %845 = vmatprep.subr.bf16.mxu0 %v894_v8  ;;  %v895_v9 = vld [vmem:[%s1185_s5 + $0x8] sm:$0xff]  }
 0x2fe   :  { %v336_v11 = vpop.xlane.xlu1 %335  ;;  %v350_v12 = vpop.xlane.xlu0 %349 }
 0x2ff   :  { %vm337_vm5 = vcmp.eq.f32.partialorder %v334_v1, %v336_v11  ;;  %vm351_vm6 = vcmp.eq.f32.partialorder %v348_v0, %v350_v12  ;;  %v342_v22 = vcvt.f32.s32 %v336_v11  ;;  %v356_v26 = vcvt.f32.s32 %v350_v12  ;;  %v897_v11 = vld [vmem:[%s1185_s5 + $0x18] sm:$0xff]   ;;  %v898_v12 = vld [vmem:[%s1185_s5 + $0x20] sm:$0xff]  }
 0x300   :  { %v338_v15 = vsel %vm337_vm5, %v333_v13, inf  ;;  %v352_v16 = vsel %vm351_vm6, %v347_v14, inf  ;;  %v899_v13 = vld [vmem:[%s1185_s5 + $0x28] sm:$0xff]   ;;  %v900_v14 = vld [vmem:[%s1185_s5 + $0x30] sm:$0xff]  }
 0x301   :  { %339 = vmin.xlane.f32.xlu1 %v338_v15  ;;  %353 = vmin.xlane.f32.xlu0 %v352_v16  ;;  %v343_v36 = vshll.u32 %v342_v22, 16  ;;  %v357_v39 = vshll.u32 %v356_v26, 16  ;;  %v901_v15 = vld [vmem:[%s1185_s5 + $0x38] sm:$0xff]  }
 0x302   :  { %v364_v17 = vpop.xlane.xlu1 %363 }
 0x303   :  { %vm365_vm7 = vcmp.eq.f32.partialorder %v362_v3, %v364_v17  ;;  %v370_v40 = vcvt.f32.s32 %v364_v17 }
 0x304   :  { %v366_v19 = vsel %vm365_vm7, %v361_v18, inf }
 0x305   :  { %367 = vmin.xlane.f32.xlu1 %v366_v19  ;;  %v371_v46 = vshll.u32 %v370_v40, 16 }
 0x38a   :  { %v326_v23 = vpop.xlane.xlu0 %325 }
 0x38b   :  { %v327_v29 = vcvt.f32.s32 %v326_v23 }
 0x38d   :  { %v330_v35 = vadd.s32 %v329_v24, %v327_v29 }
 0x38e   :  { %v340_v37 = vpop.xlane.xlu1 %339  ;;  %v354_v38 = vpop.xlane.xlu0 %353 }
 0x38f   :  { %v341_v41 = vcvt.f32.s32 %v340_v37  ;;  %v355_v42 = vcvt.f32.s32 %v354_v38  ;;  %vm373_vm8 = vcmp.eq.s32.totalorder %v1097_v51, %v330_v35 }
 0x390   :  { %v728_v48 = vsel %vm373_vm8, 1.0, %v954_v20 }
 0x391   :  { %v344_v43 = vadd.s32 %v343_v36, %v341_v41  ;;  %v358_v44 = vadd.s32 %v357_v39, %v355_v42 }
 0x392   :  { %v368_v45 = vpop.xlane.xlu1 %367 }
 0x393   :  { %vm375_vm9 = vcmp.eq.s32.totalorder %v1097_v51, %v358_v44  ;;  %v369_v47 = vcvt.f32.s32 %v368_v45  ;;  %vm374_vm10 = vcmp.eq.s32.totalorder %v1097_v51, %v344_v43 }
 0x394   :  { %v729_v49 = vsel %vm374_vm10, 1.0, %v954_v20  ;;  %vm732_vm11 = vmpackc.low %vm374_vm10, %vm373_vm8  ;;  %v730_v54 = vsel %vm375_vm9, 1.0, %v954_v20 }
 0x395   :  { %v372_v50 = vadd.s32 %v371_v46, %v369_v47  ;;  %841 = vmatprep.mubr.msk.bf16.mxu0 %vm732_vm11, %v955_v52  ;;  %v488_v53 = vadd.f32 %v729_v49, %v728_v48 }
 0x397   :  { %vm376_vm12 = vcmp.eq.s32.totalorder %v1097_v51, %v372_v50  ;;  %v489_v55 = vadd.f32 %v730_v54, %v488_v53 }
 0x398   :  { %v731_v56 = vsel %vm376_vm12, 1.0, %v954_v20  ;;  %vm734_vm13 = vmpackc.low %vm376_vm12, %vm375_vm9 }
 0x399   :  { %v490_v57 = vadd.f32 %v731_v56, %v489_v55  ;;  %842 = vmatmul.mubr.msk.bf16.vlgmr.msra.gmra.mrb[4].mxu0 %vm734_vm13, %v955_v52 }
 0x39a   :  { %846 = vmatpush3.bf16.msra.mxu0 %v894_v8 }
 0x39b   :  { %v491_v58 = vrot.slane %v490_v57, 4  ;;  %847 = vmatprep.subr.bf16.mxu0 %v895_v9 }
 0x39d   :  { %v492_v59 = vadd.f32 %v491_v58, %v490_v57  ;;  %v736_v58 = vld [vmem:[%s1186_s6] ss:$0 sm:$0xff] }
 0x39e   :  { %848 = vmatpush3.bf16.msra.mxu0 %v895_v9 }
 0x39f   :  { %v493_v60 = vrot.slane %v492_v59, 2  ;;  %849 = vmatprep.subr.bf16.mxu0 %v896_v10 }
 0x3a1   :  { %v494_v61 = vadd.f32 %v493_v60, %v492_v59 }
 0x3a2   :  { %850 = vmatpush3.bf16.msra.mxu0 %v896_v10 }
 0x3a3   :  { %v495_v62 = vrot.slane %v494_v61, 1  ;;  %851 = vmatprep.subr.bf16.mxu0 %v897_v11 }
 0x3a5   :  { %v496_v0 = vadd.f32 %v495_v62, %v494_v61 }
 0x3a6   :  { %852 = vmatpush3.bf16.msra.mxu0 %v897_v11 }
 0x3a7   :  { %v497_v1 = vadd.f32 %v496_v0, %v483_v63  ;;  %853 = vmatprep.subr.bf16.mxu0 %v898_v12 }
 0x3a9   :  { %498 = vst [vmem:[#allocation2] sm:$0x1] %v497_v1 }
 0x3aa   :  { %854 = vmatpush3.bf16.msra.mxu0 %v898_v12 }
 0x3ab   :  { %855 = vmatprep.subr.bf16.mxu0 %v899_v13 }
 0x3ae   :  { %856 = vmatpush3.bf16.msra.mxu0 %v899_v13 }
 0x3af   :  { %857 = vmatprep.subr.bf16.mxu0 %v900_v14 }
 0x3b0   :  { %v643_v2 = vld [vmem:[#allocation2] sm:$0x1] }
 0x3b1   :  { %v645_v3 = vmul.f32 0.03125, %v643_v2 }
 0x3b2   :  { %858 = vmatpush3.bf16.msra.mxu0 %v900_v14 }
 0x3b3   :  { %v646_v4 = vadd.f32 1e-10, %v645_v3  ;;  %859 = vmatprep.subr.bf16.mxu0 %v901_v15 }
 0x3b5   :  { %902 = vlog2.f32 %v646_v4 }
 0x3b6   :  { %860 = vmatpush3.bf16.msra.mxu0 %v901_v15 }
 0x3bf   :  { %v903_v5 = vpop.eup %902 }
 0x3c0   :  { %v648_v51 = vmul.f32 0.6931472, %v903_v5 }
 0x3c2   :  { %v649_v6 = vmul.f32 %v648_v51, %v645_v3 }
 0x3c4   :  { %v650_v7 = vsel %vm629_vm14, %v649_v6, 0.0 }
 0x3c5   :  { %651 = vadd.xlane.f32.xlu1 %v650_v7 }
 0x46c   :  { %v843_v16 = vpop.f32.mrb[4].mxu0 }
 0x46d   :  { %v444_v17 = vpop.f32.mrb[5].mxu0  ;;  %v461_v22 = vsub.f32 %v843_v16, %v167_v34 }
 0x46e   :  { %v459_v18 = vsub.f32 %v444_v17, %v165_v32  ;;  %v844_v19 = vpop.f32.mrb[6].mxu0 }
 0x46f   :  { %v500_v20 = vpack.c.bf16 %v844_v19, %v843_v16  ;;  %v447_v21 = vpop.f32.mrb[7].mxu0  ;;  %v462_v29 = vsub.f32 %v844_v19, %v168_v31  ;;  %v470_v36 = vmul.f32 %v461_v22, %v461_v22  ;;  %v652_v31 = vpop.xlane.xlu1 %651 }
 0x470   :  { %v460_v23 = vsub.f32 %v447_v21, %v166_v33  ;;  %v499_v24 = vpack.c.bf16 %v447_v21, %v444_v17  ;;  %v468_v26 = vmul.f32 %v459_v18, %v459_v18  ;;  %v653_v44 = vrot.slane %v652_v31, 4 }
 0x471   :  { %v471_v32 = vmul.f32 %v462_v29, %v462_v29 }
 0x472   :  { %v469_v35 = vmul.f32 %v460_v23, %v460_v23  ;;  %861 = vmatprep.mubr.bf16.mxu0 %v499_v24  ;;  %v654_v45 = vadd.f32 %v653_v44, %v652_v31 }
 0x473   :  { %862 = vmatmul.mubr.bf16.vlgmr.msra.gmra.mrb[8].mxu0 %v500_v20 }
 0x474   :  { %v472_v25 = vadd.f32 %v469_v35, %v468_v26  ;;  %v655_v46 = vrot.slane %v654_v45, 2 }
 0x476   :  { %v473_v37 = vadd.f32 %v472_v25, %v470_v36  ;;  %v656_v50 = vadd.f32 %v655_v46, %v654_v45 }
 0x478   :  { %v474_v38 = vadd.f32 %v473_v37, %v471_v32  ;;  %v657_v54 = vrot.slane %v656_v50, 1 }
 0x47a   :  { %v475_v39 = vrot.slane %v474_v38, 4  ;;  %v658_v57 = vadd.f32 %v657_v54, %v656_v50 }
 0x47c   :  { %v476_v40 = vadd.f32 %v475_v39, %v474_v38 }
 0x47e   :  { %v477_v27 = vrot.slane %v476_v40, 2 }
 0x480   :  { %v478_v34 = vadd.f32 %v477_v27, %v476_v40 }
 0x482   :  { %v479_v41 = vrot.slane %v478_v34, 1 }
 0x484   :  { %v480_v33 = vadd.f32 %v479_v41, %v478_v34 }
 0x486   :  { %v481_v42 = vadd.f32 %v480_v33, %v467_v30 }
 0x488   :  { %482 = vst [vmem:[#allocation3] sm:$0x1] %v481_v42 }
 0x48f   :  { %v628_v43 = vld [vmem:[#allocation3] sm:$0x1] }
 0x490   :  { %v630_v28 = vsel %vm629_vm14, %v628_v43, 0.0 }
 0x491   :  { %631 = vadd.xlane.f32.xlu0 %v630_v28 }
 0x51e   :  { %v632_v47 = vpop.xlane.xlu0 %631 }
 0x51f   :  { %v633_v48 = vrot.slane %v632_v47, 4 }
 0x521   :  { %v634_v49 = vadd.f32 %v633_v48, %v632_v47 }
 0x523   :  { %v635_v52 = vrot.slane %v634_v49, 2 }
 0x525   :  { %v636_v53 = vadd.f32 %v635_v52, %v634_v49 }
 0x527   :  { %v637_v55 = vrot.slane %v636_v53, 1 }
 0x529   :  { %v638_v56 = vadd.f32 %v637_v55, %v636_v53 }
 0x52b   :  { %865 = vpush %v638_v56 }
 0x52c   :  { %867 = vpush %v658_v57 }
 0x546   :  { %v863_v59 = vpop.f32.mrb[8].mxu0 }
 0x547   :  { %v615_v60 = vadd.f32 %v863_v59, %v736_v58  ;;  %v606_v61 = vpop.f32.mrb[9].mxu0 }
 0x548   :  { %v607_v62 = vadd.f32 %v736_v58, %v606_v61  ;;  %v864_v63 = vpop.f32.mrb[10].mxu0 }
 0x549   :  { %623 = vst [vmem:[#allocation4 + $0x10] sm:$0xff] %v615_v60  ;;  %v618_v0 = vadd.f32 %v864_v63, %v736_v58  ;;  %v609_v1 = vpop.f32.mrb[11].mxu0 }
 0x54a   :  { %621 = vst [vmem:[#allocation4] sm:$0xff] %v607_v62  ;;  %v610_v2 = vadd.f32 %v736_v58, %v609_v1 }
 0x54b   :  { %624 = vst [vmem:[#allocation4 + $0x18] sm:$0xff] %v618_v0 }
 0x54c   :  { %622 = vst [vmem:[#allocation4 + $0x8] sm:$0xff] %v610_v2 }
 0x54d   :  { %917 = shalt.err (!%p914_p4)
}
 0x54e   :  { %s918_s25 = scalar_lea.hbm %s1187_s7, 512 }
 0x54f   :  { %p919_p5 = scmp.ne.s32.totalorder %s1187_s7, %s918_s25  ;;  %p922_p6 = scmp.lt.u32.totalorder %s918_s25, %s1187_s7 }
 0x551   :  { %p924_p7 = pnand %p922_p6, %p919_p5 }
 0x553   :  { %927 = shalt.err (!%p924_p7)
}
 0x554   :  { %s957_s4 = smov 128   ;;  %s958_s28 = smov 8  }
 0x555   :  { %680 = dma.vmem_to_hbm [thread:$0]  %s675_s0, 512, %s1187_s7, [#allocation5], %s957_s4, %s957_s4, %s958_s28  }
 0x556   :  { %s928_s16 = scalar_lea.hbm %s1188_s8, 16 }
 0x557   :  { %p929_p8 = scmp.ne.s32.totalorder %s1188_s8, %s928_s16  ;;  %p932_p9 = scmp.lt.u32.totalorder %s928_s16, %s1188_s8 }
 0x559   :  { %p934_p10 = pnand %p932_p9, %p929_p8 }
 0x55c   :  { %s866_s10 = spop %865 }
 0x55d   :  { %s642_s11 = smul.f32 0.00048828125, %s866_s10  ;;  %s868_s12 = spop %867 }
 0x55e   :  { %s660_s13 = ssub.f32 0.0, %s868_s12 }
 0x55f   :  { %666 = sst [smem:[#allocation7]] %s642_s11 }
 0x560   :  { %v661_v3 = vstv %s660_s13 }
 0x561   :  { %937 = shalt.err (!%p934_p10)
}
 0x562   :  { %s959_s7 = smov [#allocation7]   ;;  %v662_v4 = vmul.f32 1.442695, %v661_v3  ;;  %s938_s23 = scalar_lea.hbm %s1189_s9, 16 }
 0x563   :  { %688 = dma.smem_to_hbm %s959_s7, 16, %s1188_s8, [#allocation6]  }
 0x564   :  { %904 = vpow2.f32 %v662_v4  ;;  %p939_p11 = scmp.ne.s32.totalorder %s1189_s9, %s938_s23  ;;  %p942_p12 = scmp.lt.u32.totalorder %s938_s23, %s1189_s9 }
 0x566   :  { %p944_p13 = pnand %p942_p12, %p939_p11 }
 0x56e   :  { %v905_v5 = vpop.eup %904 }
 0x56f   :  { %869 = vpush %v905_v5 }
 0x5a0   :  { %s870_s21 = spop %869 }
 0x5a1   :  { %668 = sst [smem:[#allocation8]] %s870_s21 }
 0x5a2   :  { %947 = shalt.err (!%p944_p13)
}
 0x5a3   :  { %s960_s8 = smov [#allocation8]  }
 0x5a4   :  { %696 = dma.smem_to_hbm %s960_s8, 16, %s1189_s9, [#allocation9]  }
 0x5a5   :  { %948 = dma.done.wait [#allocation5], 512  }
 0x5a6   :  { %949 = vsyncadd [#allocation5], 4294966784 }
 0x5a7   :  { %950 = dma.done.wait [#allocation6], 16  }
 0x5a8   :  { %951 = vsyncadd [#allocation6], 4294967280 }
 0x5a9   :  { %952 = dma.done.wait [#allocation9], 16  }
 0x5aa   :  { %953 = vsyncadd [#allocation9], 4294967280 }
 0x5ab   :  { %706 = sfence }
 0x5ac   :  { %707 = vsyncpa [#allocation5], 1 }
 0x5ad   :  { %708 = vsyncpa [#allocation6], 1 }
 0x5ae   :  { %709 = vsyncpa [#allocation9], 1 }

</bundles_post_ra>
